<compile_context>
chip_gen: v5e
topology: v5e:2x2
jax: 0.10.0
libtpu: 0.0.40
codegen_flags: <defaults>
</compile_context>

<pallas_src>
import jax
import jax.numpy as jnp
from jax.experimental import pallas as pl
from jax.experimental.pallas import tpu as pltpu

D_IN = 784                     # 28 * 28, streamed at its true width (no K padding)
H1, H2, H3, D_OUT = 128, 64, 12, 3
PAD = 128                      # hidden dims padded to one full lane group
OUT_PAD = 8                    # final output padded only to 8 lanes (block dim == full array dim)


def encoder_kernel(x_ref, w1_ref, ws_ref, w4_ref, b_ref, b4_ref, o_ref):
    cdt = w1_ref.dtype                        # MXU operand dtype (bf16 by default, or f32)
    x = x_ref[...].astype(cdt)                # in-kernel cast: x streams in its native dtype
    b = b_ref[...]                            # (3, 128) f32, grid-resident
    # Layer 1: (tb, 784) @ (784, 128)
    h = jnp.dot(x, w1_ref[...], preferred_element_type=jnp.float32)
    h = jnp.maximum(h + b[0:1, :], 0.0)
    # Layer 2: (tb, 128) @ (128, 128)   (cols >= 64 are zero padding)
    h = jnp.dot(h.astype(cdt), ws_ref[0], preferred_element_type=jnp.float32)
    h = jnp.maximum(h + b[1:2, :], 0.0)
    # Layer 3: (tb, 128) @ (128, 128)   (cols >= 12 are zero padding)
    h = jnp.dot(h.astype(cdt), ws_ref[1], preferred_element_type=jnp.float32)
    h = jnp.maximum(h + b[2:3, :], 0.0)
    # Layer 4: (tb, 128) @ (128, 8)     (cols >= 3 are zero padding), no activation
    h = jnp.dot(h.astype(cdt), w4_ref[...], preferred_element_type=jnp.float32)
    o_ref[...] = (h + b4_ref[...]).astype(o_ref.dtype)


def _cdiv(a, b):
    return -(-a // b)


def _round_up(n, m):
    return _cdiv(n, m) * m


def _pad2(a, rows, cols):
    r, c = a.shape
    return jnp.pad(a, ((0, rows - r), (0, cols - c)))


def encoder_forward(x, params, *, tb=2048, param_dtype=jnp.bfloat16):
    """x: (B, 784). params: PyTorch-convention weights (out, in) / biases (out,)."""
    B, d_in = x.shape
    assert d_in == D_IN

    # ---- weights: transpose to (in, out), zero-pad to lane-dense shapes, pack, cast ----
    w1 = params["w1"].T.astype(param_dtype)                                # (784, 128)
    ws = jnp.stack([
        _pad2(params["w2"].T, PAD, PAD),                                   # (128, 128)
        _pad2(params["w3"].T, PAD, PAD),
    ]).astype(param_dtype)                                                 # (2, 128, 128)
    w4 = _pad2(params["w4"].T, PAD, OUT_PAD).astype(param_dtype)           # (128, 8)
    b123 = jnp.stack([
        params["b1"],
        jnp.pad(params["b2"], (0, PAD - H2)),
        jnp.pad(params["b3"], (0, PAD - H3)),
    ]).astype(jnp.float32)                                                 # (3, 128)
    b4 = jnp.pad(params["b4"], (0, OUT_PAD - D_OUT)).reshape(1, OUT_PAD).astype(jnp.float32)

    # ---- balanced batch split; >= 2 grid steps for mid-size B so v7x's 2 TCs both work ----
    sub = 16 if x.dtype == jnp.bfloat16 else 8          # sublane multiple for the x block
    n_blocks = max(1, _cdiv(B, tb))
    if n_blocks == 1 and B >= 2 * sub:
        n_blocks = 2
    tb_eff = _round_up(_cdiv(B, n_blocks), sub)
    n_steps = _cdiv(B, tb_eff)
    b_pad = n_steps * tb_eff
    # No wrapper-side cast of x (kernel casts per tile); pad batch only when actually ragged.
    xk = x if b_pad == B else jnp.pad(x, ((0, b_pad - B), (0, 0)))

    x_item = jnp.dtype(x.dtype).itemsize
    w_item = jnp.dtype(param_dtype).itemsize
    cost = pl.CostEstimate(
        flops=2 * b_pad * (D_IN * PAD + 2 * PAD * PAD + PAD * OUT_PAD),
        transcendentals=0,
        bytes_accessed=(b_pad * D_IN * x_item
                        + (D_IN * PAD + 2 * PAD * PAD + PAD * OUT_PAD) * w_item
                        + (3 * PAD + OUT_PAD) * 4
                        + b_pad * OUT_PAD * 4),
    )

    out = pl.pallas_call(
        encoder_kernel,
        out_shape=jax.ShapeDtypeStruct((b_pad, OUT_PAD), jnp.float32),
        grid=(n_steps,),
        in_specs=[
            pl.BlockSpec((tb_eff, D_IN), lambda i: (i, 0)),        # x: streamed over batch
            pl.BlockSpec((D_IN, PAD), lambda i: (0, 0)),           # w1: grid-resident
            pl.BlockSpec((2, PAD, PAD), lambda i: (0, 0, 0)),      # w2, w3 packed: resident
            pl.BlockSpec((PAD, OUT_PAD), lambda i: (0, 0)),        # w4 (narrow out): resident
            pl.BlockSpec((3, PAD), lambda i: (0, 0)),              # b1..b3 packed: resident
            pl.BlockSpec((1, OUT_PAD), lambda i: (0, 0)),          # b4: resident
        ],
        out_specs=pl.BlockSpec((tb_eff, OUT_PAD), lambda i: (i, 0)),
        compiler_params=pltpu.CompilerParams(
            dimension_semantics=("parallel",),
            vmem_limit_bytes=32 * 1024 * 1024,
        ),
        cost_estimate=cost,
    )(xk, w1, ws, w4, b123, b4)

    return out[:B, :D_OUT]


def init_params(key):
    """Deterministic synthetic init matching nn.Linear shapes (out_features, in_features)."""
    dims = [(128, 784), (64, 128), (12, 64), (3, 12)]
    params = {}
    for idx, (out_f, in_f) in enumerate(dims, start=1):
        key, kw, kb = jax.random.split(key, 3)
        scale = 1.0 / jnp.sqrt(in_f)
        params[f"w{idx}"] = jax.random.uniform(kw, (out_f, in_f), jnp.float32, -scale, scale)
        params[f"b{idx}"] = jax.random.uniform(kb, (out_f,), jnp.float32, -scale, scale)
    return params


def encoder_ref(x, p):
    h = jnp.maximum(x @ p["w1"].T + p["b1"], 0.0)
    h = jnp.maximum(h @ p["w2"].T + p["b2"], 0.0)
    h = jnp.maximum(h @ p["w3"].T + p["b3"], 0.0)
    return h @ p["w4"].T + p["b4"]


if __name__ == "__main__":
    key = jax.random.PRNGKey(0)
    key, kx = jax.random.split(key)
    B = 8
    x = jax.random.normal(kx, (B, 28 * 28), jnp.float32)
    params = init_params(key)
    ref = encoder_ref(x, params)

    # Default path: bf16 weights + in-kernel bf16 cast of x, f32 accumulation (looser tolerance).
    out_bf16 = jax.block_until_ready(encoder_forward(x, params))
    assert out_bf16.shape == (B, 3)
    assert jnp.allclose(out_bf16, ref, atol=5e-2, rtol=5e-2), "bf16 mismatch vs reference"

    # f32 path (exact vs reference up to MXU rounding).
    out_f32 = jax.block_until_ready(encoder_forward(x, params, param_dtype=jnp.float32))
    assert out_f32.shape == (B, 3)
    assert jnp.allclose(out_f32, ref, atol=1e-4, rtol=1e-4), "f32 mismatch vs reference"

    # Ragged batch exercises the balanced split + >=2-step grid + batch padding.
    x2 = jax.random.normal(jax.random.PRNGKey(1), (37, 28 * 28), jnp.float32)
    out2 = jax.block_until_ready(encoder_forward(x2, params, param_dtype=jnp.float32))
    assert out2.shape == (37, 3)
    assert jnp.allclose(out2, encoder_ref(x2, params), atol=1e-4, rtol=1e-4), "ragged-batch mismatch"

    print("KERNEL_OK")
</pallas_src>

<mosaic_0001>
module attributes {stable_mosaic.version = 11 : i64} {
  func.func @encoder_kernel(%arg0: i32, %arg1: memref<8x784xf32, #tpu.memory_space<vmem>>, %arg2: memref<784x128xbf16, #tpu.memory_space<vmem>>, %arg3: memref<2x128x128xbf16, #tpu.memory_space<vmem>>, %arg4: memref<128x8xbf16, #tpu.memory_space<vmem>>, %arg5: memref<3x128xf32, #tpu.memory_space<vmem>>, %arg6: memref<1x8xf32, #tpu.memory_space<vmem>>, %arg7: memref<8x8xf32, #tpu.memory_space<vmem>>) attributes {dimension_semantics = [#tpu.dimension_semantics<parallel>], iteration_bounds = array<i64: 1>, scalar_prefetch = 0 : i64, scratch_operands = 0 : i64, tpu.core_type = #tpu.core_type<tc>, window_params = [{transform_indices = @transform_0, window_bounds = array<i64: 8, 784>}, {pipeline_mode = #tpu.pipeline_mode<synchronous>, transform_indices = @transform_1, window_bounds = array<i64: 784, 128>}, {pipeline_mode = #tpu.pipeline_mode<synchronous>, transform_indices = @transform_2, window_bounds = array<i64: 2, 128, 128>}, {pipeline_mode = #tpu.pipeline_mode<synchronous>, transform_indices = @transform_3, window_bounds = array<i64: 128, 8>}, {pipeline_mode = #tpu.pipeline_mode<synchronous>, transform_indices = @transform_4, window_bounds = array<i64: 3, 128>}, {pipeline_mode = #tpu.pipeline_mode<synchronous>, transform_indices = @transform_5, window_bounds = array<i64: 1, 8>}, {transform_indices = @transform_6, window_bounds = array<i64: 8, 8>}]} {
    %c0 = arith.constant 0 : index
    %c0_0 = arith.constant 0 : index
    %0 = vector.load %arg1[%c0, %c0_0] : memref<8x784xf32, #tpu.memory_space<vmem>>, vector<8x784xf32>
    %1 = arith.truncf %0 : vector<8x784xf32> to vector<8x784xbf16>
    %c0_1 = arith.constant 0 : index
    %c0_2 = arith.constant 0 : index
    %2 = vector.load %arg5[%c0_1, %c0_2] : memref<3x128xf32, #tpu.memory_space<vmem>>, vector<3x128xf32>
    %c0_3 = arith.constant 0 : index
    %c0_4 = arith.constant 0 : index
    %3 = vector.load %arg2[%c0_3, %c0_4] : memref<784x128xbf16, #tpu.memory_space<vmem>>, vector<784x128xbf16>
    %cst = arith.constant dense<0.000000e+00> : vector<8x128xf32>
    %4 = tpu.matmul %1, %3, %cst {dimension_numbers = #tpu.dot_dimension_numbers<[1], [0], [0], [1], [0, 0, 1, 1], [], []>} : vector<8x784xbf16>, vector<784x128xbf16>, vector<8x128xf32> -> vector<8x128xf32>
    %5 = vector.extract_strided_slice %2 {offsets = [0, 0], sizes = [1, 128], strides = [1, 1]} : vector<3x128xf32> to vector<1x128xf32>
    %6 = vector.broadcast %5 : vector<1x128xf32> to vector<8x128xf32>
    %7 = arith.addf %4, %6 : vector<8x128xf32>
    %cst_5 = arith.constant 0.000000e+00 : f32
    %8 = vector.broadcast %cst_5 : f32 to vector<8x128xf32>
    %9 = arith.maximumf %7, %8 : vector<8x128xf32>
    %10 = arith.truncf %9 : vector<8x128xf32> to vector<8x128xbf16>
    %c0_6 = arith.constant 0 : index
    %c0_7 = arith.constant 0 : index
    %c0_8 = arith.constant 0 : index
    %11 = vector.load %arg3[%c0_6, %c0_7, %c0_8] : memref<2x128x128xbf16, #tpu.memory_space<vmem>>, vector<1x128x128xbf16>
    %12 = vector.shape_cast %11 : vector<1x128x128xbf16> to vector<128x128xbf16>
    %cst_9 = arith.constant dense<0.000000e+00> : vector<8x128xf32>
    %13 = tpu.matmul %10, %12, %cst_9 {dimension_numbers = #tpu.dot_dimension_numbers<[1], [0], [0], [1], [0, 0, 1, 1], [], []>} : vector<8x128xbf16>, vector<128x128xbf16>, vector<8x128xf32> -> vector<8x128xf32>
    %14 = vector.extract_strided_slice %2 {offsets = [1, 0], sizes = [1, 128], strides = [1, 1]} : vector<3x128xf32> to vector<1x128xf32>
    %15 = vector.broadcast %14 : vector<1x128xf32> to vector<8x128xf32>
    %16 = arith.addf %13, %15 : vector<8x128xf32>
    %cst_10 = arith.constant 0.000000e+00 : f32
    %17 = vector.broadcast %cst_10 : f32 to vector<8x128xf32>
    %18 = arith.maximumf %16, %17 : vector<8x128xf32>
    %19 = arith.truncf %18 : vector<8x128xf32> to vector<8x128xbf16>
    %c1 = arith.constant 1 : index
    %c0_11 = arith.constant 0 : index
    %c0_12 = arith.constant 0 : index
    %20 = vector.load %arg3[%c1, %c0_11, %c0_12] : memref<2x128x128xbf16, #tpu.memory_space<vmem>>, vector<1x128x128xbf16>
    %21 = vector.shape_cast %20 : vector<1x128x128xbf16> to vector<128x128xbf16>
    %cst_13 = arith.constant dense<0.000000e+00> : vector<8x128xf32>
    %22 = tpu.matmul %19, %21, %cst_13 {dimension_numbers = #tpu.dot_dimension_numbers<[1], [0], [0], [1], [0, 0, 1, 1], [], []>} : vector<8x128xbf16>, vector<128x128xbf16>, vector<8x128xf32> -> vector<8x128xf32>
    %23 = vector.extract_strided_slice %2 {offsets = [2, 0], sizes = [1, 128], strides = [1, 1]} : vector<3x128xf32> to vector<1x128xf32>
    %24 = vector.broadcast %23 : vector<1x128xf32> to vector<8x128xf32>
    %25 = arith.addf %22, %24 : vector<8x128xf32>
    %cst_14 = arith.constant 0.000000e+00 : f32
    %26 = vector.broadcast %cst_14 : f32 to vector<8x128xf32>
    %27 = arith.maximumf %25, %26 : vector<8x128xf32>
    %28 = arith.truncf %27 : vector<8x128xf32> to vector<8x128xbf16>
    %c0_15 = arith.constant 0 : index
    %c0_16 = arith.constant 0 : index
    %29 = vector.load %arg4[%c0_15, %c0_16] : memref<128x8xbf16, #tpu.memory_space<vmem>>, vector<128x8xbf16>
    %cst_17 = arith.constant dense<0.000000e+00> : vector<8x8xf32>
    %30 = tpu.matmul %28, %29, %cst_17 {dimension_numbers = #tpu.dot_dimension_numbers<[1], [0], [0], [1], [0, 0, 1, 1], [], []>} : vector<8x128xbf16>, vector<128x8xbf16>, vector<8x8xf32> -> vector<8x8xf32>
    %c0_18 = arith.constant 0 : index
    %c0_19 = arith.constant 0 : index
    %31 = vector.load %arg6[%c0_18, %c0_19] : memref<1x8xf32, #tpu.memory_space<vmem>>, vector<1x8xf32>
    %32 = vector.broadcast %31 : vector<1x8xf32> to vector<8x8xf32>
    %33 = arith.addf %30, %32 : vector<8x8xf32>
    %c0_20 = arith.constant 0 : index
    %c0_21 = arith.constant 0 : index
    %34 = vector.load %arg7[%c0_20, %c0_21] : memref<8x8xf32, #tpu.memory_space<vmem>>, vector<8x8xf32>
    tpu.vector_store %arg7[%c0_20, %c0_21], %33 {strides = array<i32>} : memref<8x8xf32, #tpu.memory_space<vmem>>, vector<8x8xf32>,
    return
  }
  func.func @transform_0(%arg0: i32) -> (i32, i32) {
    %c0_i32 = arith.constant 0 : i32
    %c0_i32_0 = arith.constant 0 : i32
    return %arg0, %c0_i32 : i32, i32
  }
  func.func @transform_1(%arg0: i32) -> (i32, i32) {
    %c0_i32 = arith.constant 0 : i32
    %c0_i32_0 = arith.constant 0 : i32
    %c0_i32_1 = arith.constant 0 : i32
    return %c0_i32, %c0_i32_0 : i32, i32
  }
  func.func @transform_2(%arg0: i32) -> (i32, i32, i32) {
    %c0_i32 = arith.constant 0 : i32
    %c0_i32_0 = arith.constant 0 : i32
    %c0_i32_1 = arith.constant 0 : i32
    %c0_i32_2 = arith.constant 0 : i32
    return %c0_i32, %c0_i32_0, %c0_i32_1 : i32, i32, i32
  }
  func.func @transform_3(%arg0: i32) -> (i32, i32) {
    %c0_i32 = arith.constant 0 : i32
    %c0_i32_0 = arith.constant 0 : i32
    %c0_i32_1 = arith.constant 0 : i32
    return %c0_i32, %c0_i32_0 : i32, i32
  }
  func.func @transform_4(%arg0: i32) -> (i32, i32) {
    %c0_i32 = arith.constant 0 : i32
    %c0_i32_0 = arith.constant 0 : i32
    %c0_i32_1 = arith.constant 0 : i32
    return %c0_i32, %c0_i32_0 : i32, i32
  }
  func.func @transform_5(%arg0: i32) -> (i32, i32) {
    %c0_i32 = arith.constant 0 : i32
    %c0_i32_0 = arith.constant 0 : i32
    %c0_i32_1 = arith.constant 0 : i32
    return %c0_i32, %c0_i32_0 : i32, i32
  }
  func.func @transform_6(%arg0: i32) -> (i32, i32) {
    %c0_i32 = arith.constant 0 : i32
    %c0_i32_0 = arith.constant 0 : i32
    return %arg0, %c0_i32 : i32, i32
  }
}

</mosaic_0001>

<bundles_post_ra>
// kernel: tpu_custom_call.1
= control target key start
LH: loop header
LB: loop body
LE: loop exit
PB: predicated region body
PF: predicated region fallthrough
CT: control target
= control target key end

     0   :  { %11 = vsyncpa [#allocation3], 0  ;;  %s1379_s0 = inlined_call_operand.vmem [shape: f32[8,784], index: 0, kind: input, shape index: {}]   ;;  %s1380_s1 = inlined_call_operand.hbm [shape: bf16[784,128], index: 1, kind: input, shape index: {}]   ;;  %s1381_s2 = inlined_call_operand.hbm [shape: bf16[2,128,128], index: 2, kind: input, shape index: {}]   ;;  %s1382_s3 = inlined_call_operand.vmem [shape: bf16[128,8], index: 3, kind: input, shape index: {}]   ;;  %s1383_s4 = inlined_call_operand.vmem [shape: f32[3,128], index: 4, kind: input, shape index: {}]   ;;  %s1384_s5 = inlined_call_operand.vmem [shape: f32[1,8], index: 5, kind: input, shape index: {}]   ;;  %s1385_s6 = inlined_call_operand.hbm [shape: f32[8,8], index: 6, kind: output, shape index: {}]  }
   0x1   :  { %12 = vsyncpa [#allocation6], 0 }
   0x2   :  { %13 = vsyncpa [#allocation4], 0  ;;  %s20_s23 = sshll.u32 %s1380_s1, 4  ;;  %s1274_s24 = smov [#allocation2]   ;;  %s21_s23 = int_to_ptr.hbm [resolvable:$true] %s20_s23 }
   0x3   :  { %s22_s25 = sshll.u32 %s1274_s24, 4  ;;  %s33_s28 = sshll.u32 %s1381_s2, 4  ;;  %s23_s25 = int_to_ptr.vmem [resolvable:$true] %s22_s25  ;;  %s34_s28 = int_to_ptr.hbm [resolvable:$true] %s33_s28 }
   0x4   :  { %s1275_s29 = smov 64   ;;  %s1276_s30 = smov 4  }
   0x5   :  { %28 = dma.hbm_to_vmem [thread:$0]  %s21_s23, 6272, %s23_s25, [#allocation3], %s1275_s29, %s1275_s29, %s1276_s30  }
   0x6   :  { %s1277_s7 = smov [#allocation5]  }
   0x7   :  { %s35_s8 = sshll.u32 %s1277_s7, 4  ;;  %s36_s8 = int_to_ptr.vmem [resolvable:$true] %s35_s8 }
   0x8   :  { %41 = dma.hbm_to_vmem [thread:$0]  %s34_s28, 2048, %s36_s8, [#allocation6], %s1275_s29, %s1275_s29, %s1276_s30  }
   0x9   :  { %1268 = dma.done.wait [#allocation3], 6272  }
   0xa   :  { %1269 = vsyncadd [#allocation3], 4294961024 }
   0xb   :  { %1270 = dma.done.wait [#allocation6], 2048  }
   0xc   :  { %1271 = vsyncadd [#allocation6], 4294965248  ;;  %v1124_v0 = vld [vmem:[#allocation2 + $0x38] sm:$0xff]  ;;  %v1123_v3 = vld [vmem:[#allocation2 + $0x30] sm:$0xff]  ;;  %vm465_vm0 = vcmask 130048   ;;  %s1278_s13 = smov [#allocation7]  }
   0xd   :  { %v1132_v1 = vld [vmem:[#allocation2 + $0x78] sm:$0xff]  ;;  %469 = vmatpush.bf16.msra.mxu0 %v1124_v0  ;;  %v1131_v4 = vld [vmem:[#allocation2 + $0x70] sm:$0xff]  ;;  %v1122_v8 = vld [vmem:[#allocation2 + $0x28] sm:$0xff]  ;;  %s811_s14 = sshll.u32 %s1278_s13, 4  ;;  %s813_s17 = sshll.u32 %s1385_s6, 4  ;;  %vm804_vm1 = vcmask 64512   ;;  %s812_s14 = int_to_ptr.vmem [resolvable:$true] %s811_s14  ;;  %s814_s17 = int_to_ptr.hbm [resolvable:$true] %s813_s17 }
   0xe   :  { %v1140_v2 = vld [vmem:[#allocation2 + $0xb8] sm:$0xff]  ;;  %482 = vmatpush.bf16.msra.mxu1 %v1132_v1  ;;  %v1139_v5 = vld [vmem:[#allocation2 + $0xb0] sm:$0xff]  ;;  %v1130_v9 = vld [vmem:[#allocation2 + $0x68] sm:$0xff] }
   0xf   :  { %495 = vmatpush.bf16.msra.mxu2 %v1140_v2  ;;  %v1148_v6 = vld [vmem:[#allocation2 + $0xf8] sm:$0xff]  ;;  %v1147_v7 = vld [vmem:[#allocation2 + $0xf0] sm:$0xff]  ;;  %v1138_v10 = vld [vmem:[#allocation2 + $0xa8] sm:$0xff] }
  0x10   :  { %508 = vmatpush.bf16.msra.mxu3 %v1148_v6  ;;  %v1146_v11 = vld [vmem:[#allocation2 + $0xe8] sm:$0xff]  ;;  %v1121_v12 = vld [vmem:[#allocation2 + $0x20] sm:$0xff]  ;;  %v1120_v16 = vld [vmem:[#allocation2 + $0x18] sm:$0xff] }
  0x11   :  { %470 = vmatpush.bf16.msra.mxu0 %v1123_v3  ;;  %v1129_v13 = vld [vmem:[#allocation2 + $0x60] sm:$0xff]  ;;  %v1128_v17 = vld [vmem:[#allocation2 + $0x58] sm:$0xff]  ;;  %v1119_v20 = vld [vmem:[#allocation2 + $0x10] sm:$0xff] }
  0x12   :  { %483 = vmatpush.bf16.msra.mxu1 %v1131_v4  ;;  %v1137_v14 = vld [vmem:[#allocation2 + $0xa0] sm:$0xff]  ;;  %v1136_v18 = vld [vmem:[#allocation2 + $0x98] sm:$0xff]  ;;  %v1127_v21 = vld [vmem:[#allocation2 + $0x50] sm:$0xff] }
  0x13   :  { %496 = vmatpush.bf16.msra.mxu2 %v1139_v5  ;;  %v1145_v15 = vld [vmem:[#allocation2 + $0xe0] sm:$0xff]  ;;  %v1144_v19 = vld [vmem:[#allocation2 + $0xd8] sm:$0xff]  ;;  %v1135_v22 = vld [vmem:[#allocation2 + $0x90] sm:$0xff] }
  0x14   :  { %509 = vmatpush.bf16.msra.mxu3 %v1147_v7  ;;  %v1143_v23 = vld [vmem:[#allocation2 + $0xd0] sm:$0xff]  ;;  %v1118_v24 = vld [vmem:[#allocation2 + $0x8] sm:$0xff]  ;;  %v1117_v27 = vld [vmem:[#allocation2] sm:$0xff] }
  0x15   :  { %471 = vmatpush.bf16.msra.mxu0 %v1122_v8  ;;  %v1126_v25 = vld [vmem:[#allocation2 + $0x48] sm:$0xff]  ;;  %v1125_v29 = vld [vmem:[#allocation2 + $0x40] sm:$0xff]  ;;  %v1156_v32 = vld [vmem:[#allocation2 + $0x138] sm:$0xff] }
  0x16   :  { %484 = vmatpush.bf16.msra.mxu1 %v1130_v9  ;;  %v1134_v26 = vld [vmem:[#allocation2 + $0x88] sm:$0xff]  ;;  %v57_v30 = vld [vmem:[%s1379_s0] sm:$0xff]  ;;  %v1164_v33 = vld [vmem:[#allocation2 + $0x178] sm:$0xff] }
  0x17   :  { %497 = vmatpush.bf16.msra.mxu2 %v1138_v10  ;;  %v1142_v28 = vld [vmem:[#allocation2 + $0xc8] sm:$0xff]  ;;  %v1133_v34 = vld [vmem:[#allocation2 + $0x80] sm:$0xff]  ;;  %v59_v35 = vld [vmem:[%s1379_s0 + $0x10] sm:$0xff]  ;;  %v64_v36 = vpack.c.bf16 %v57_v30, %v57_v30 }
  0x18   :  { %510 = vmatpush.bf16.msra.mxu3 %v1146_v11  ;;  %v58_v31 = vld [vmem:[%s1379_s0 + $0x8] sm:$0xff]  ;;  %v1141_v38 = vld [vmem:[#allocation2 + $0xc0] sm:$0xff]  ;;  %v60_v40 = vld [vmem:[%s1379_s0 + $0x18] sm:$0xff]  ;;  %v66_v43 = vpack.c.bf16 %v59_v35, %v59_v35 }
  0x19   :  { %472 = vmatpush.bf16.msra.mxu0 %v1121_v12  ;;  %v65_v37 = vpack.c.bf16 %v58_v31, %v58_v31  ;;  %v1165_v39 = vld [vmem:[#allocation2 + $0x180] sm:$0xff]  ;;  %v1155_v41 = vld [vmem:[#allocation2 + $0x130] sm:$0xff]  ;;  %v67_v44 = vpack.c.bf16 %v60_v40, %v60_v40  ;;  %v1154_v45 = vld [vmem:[#allocation2 + $0x128] sm:$0xff] }
  0x1a   :  { %485 = vmatpush.bf16.msra.mxu1 %v1129_v13  ;;  %v1163_v42 = vld [vmem:[#allocation2 + $0x170] sm:$0xff]  ;;  %v1162_v46 = vld [vmem:[#allocation2 + $0x168] sm:$0xff]  ;;  %v1153_v47 = vld [vmem:[#allocation2 + $0x120] sm:$0xff] }
  0x1b   :  { %498 = vmatpush.bf16.msra.mxu2 %v1137_v14  ;;  %v1161_v48 = vld [vmem:[#allocation2 + $0x160] sm:$0xff]  ;;  %v1152_v49 = vld [vmem:[#allocation2 + $0x118] sm:$0xff]  ;;  %v63_v51 = vld [vmem:[%s1379_s0 + $0x30] sm:$0xff] }
  0x1c   :  { %511 = vmatpush.bf16.msra.mxu3 %v1145_v15  ;;  %v1160_v50 = vld [vmem:[#allocation2 + $0x158] sm:$0xff]  ;;  %v1151_v52 = vld [vmem:[#allocation2 + $0x110] sm:$0xff]  ;;  %v70_v54 = vpack.c.bf16 %v63_v51, %v63_v51  ;;  %v1150_v55 = vld [vmem:[#allocation2 + $0x108] sm:$0xff] }
  0x1d   :  { %473 = vmatpush.bf16.msra.mxu0 %v1120_v16  ;;  %v1159_v53 = vld [vmem:[#allocation2 + $0x150] sm:$0xff]  ;;  %v1158_v56 = vld [vmem:[#allocation2 + $0x148] sm:$0xff]  ;;  %v1149_v57 = vld [vmem:[#allocation2 + $0x100] sm:$0xff] }
  0x1e   :  { %486 = vmatpush.bf16.msra.mxu1 %v1128_v17  ;;  %v1157_v58 = vld [vmem:[#allocation2 + $0x140] sm:$0xff]  ;;  %v62_v60 = vld [vmem:[%s1379_s0 + $0x28] sm:$0xff]  ;;  %v1172_v0 = vld [vmem:[#allocation5 + $0x30] sm:$0xff] }
  0x1f   :  { %499 = vmatpush.bf16.msra.mxu2 %v1136_v18  ;;  %v61_v59 = vld [vmem:[%s1379_s0 + $0x20] sm:$0xff]  ;;  %v69_v62 = vpack.c.bf16 %v62_v60, %v62_v60  ;;  %v1171_v1 = vld [vmem:[#allocation5 + $0x28] sm:$0xff]  ;;  %v1170_v2 = vld [vmem:[#allocation5 + $0x20] sm:$0xff] }
  0x20   :  { %512 = vmatpush.bf16.msra.mxu3 %v1144_v19  ;;  %v68_v61 = vpack.c.bf16 %v61_v59, %v61_v59  ;;  %v1173_v63 = vld [vmem:[#allocation5 + $0x38] sm:$0xff]  ;;  %v1168_v4 = vld [vmem:[#allocation5 + $0x10] sm:$0xff]  ;;  %v1167_v5 = vld [vmem:[#allocation5 + $0x8] sm:$0xff] }
  0x21   :  { %474 = vmatpush.bf16.msra.mxu0 %v1119_v20  ;;  %v1169_v3 = vld [vmem:[#allocation5 + $0x18] sm:$0xff]  ;;  %v1166_v8 = vld [vmem:[#allocation5] sm:$0xff]  ;;  %v1180_v15 = vld [vmem:[#allocation5 + $0x70] sm:$0xff] }
  0x22   :  { %487 = vmatpush.bf16.msra.mxu1 %v1127_v21  ;;  %v1181_v11 = vld [vmem:[#allocation5 + $0x78] sm:$0xff]  ;;  %v1179_v17 = vld [vmem:[#allocation5 + $0x68] sm:$0xff]  ;;  %v1178_v21 = vld [vmem:[#allocation5 + $0x60] sm:$0xff] }
  0x23   :  { %500 = vmatpush.bf16.msra.mxu2 %v1135_v22  ;;  %v1344_v12 = vld [vmem:[%s1383_s4] sm:$0x7]  ;;  %v1189_v40 = vld [vmem:[%s1382_s3 + $0x38] sm:$0xff] }
  0x24   :  { %513 = vmatpush.bf16.msra.mxu3 %v1143_v23  ;;  %v170_v16 = vperm.slane %v1344_v12, 0  ;;  %v1177_v23 = vld [vmem:[#allocation5 + $0x58] sm:$0xff] }
  0x25   :  { %475 = vmatpush.bf16.msra.mxu0 %v1118_v24  ;;  %v1195_v60 = vld [vmem:[%s1384_s5] ss:$0 sm:$0xff] }
  0x26   :  { %488 = vmatpush.bf16.msra.mxu1 %v1126_v25 }
  0x27   :  { %501 = vmatpush.bf16.msra.mxu2 %v1134_v26  ;;  %v1176_v26 = vld [vmem:[#allocation5 + $0x50] sm:$0xff] }
  0x28   :  { %514 = vmatpush.bf16.msra.mxu3 %v1142_v28 }
  0x29   :  { %476 = vmatpush.bf16.msra.mxu0 %v1117_v27 }
  0x2a   :  { %489 = vmatpush.bf16.msra.mxu1 %v1125_v29 }
  0x2b   :  { %502 = vmatpush.bf16.msra.mxu2 %v1133_v34 }
  0x2c   :  { %477 = vmatmul.bf16.vlgmr.msra.gmra.mxu0 %v64_v36  ;;  %515 = vmatpush.bf16.msra.mxu3 %v1141_v38  ;;  %v1175_v38 = vld [vmem:[#allocation5 + $0x48] sm:$0xff] }
  0x2d   :  { %521 = vmatpush.bf16.msrb.mxu0 %v1156_v32  ;;  %490 = vmatmul.bf16.vlgmr.msra.gmra.mxu1 %v65_v37 }
  0x2e   :  { %534 = vmatpush.bf16.msrb.mxu1 %v1164_v33  ;;  %503 = vmatmul.bf16.vlgmr.msra.gmra.mxu2 %v66_v43  ;;  %v1186_v43 = vld [vmem:[%s1382_s3 + $0x20] sm:$0xff] }
  0x2f   :  { %554 = vmatpush.bf16.msrb.mxu2 %v1165_v39  ;;  %516 = vmatmul.bf16.vlgmr.msra.gmra.mxu3 %v67_v44  ;;  %v1174_v39 = vld [vmem:[#allocation5 + $0x40] sm:$0xff]  ;;  %v1185_v44 = vld [vmem:[%s1382_s3 + $0x18] sm:$0xff] }
  0x30   :  { %627 = vmatpush.bf16.msrb.mxu3 %v1173_v63 }
  0x31   :  { %522 = vmatpush.bf16.msrb.mxu0 %v1155_v41  ;;  %v1188_v41 = vld [vmem:[%s1382_s3 + $0x30] sm:$0xff] }
  0x32   :  { %535 = vmatpush.bf16.msrb.mxu1 %v1163_v42  ;;  %v1187_v42 = vld [vmem:[%s1382_s3 + $0x28] sm:$0xff] }
  0x33   :  { %708 = vmatpush.bf16.msra.mxu2 %v1181_v11 }
  0x34   :  { %628 = vmatpush.bf16.msrb.mxu3 %v1172_v0 }
  0x35   :  { %523 = vmatpush.bf16.msrb.mxu0 %v1154_v45  ;;  %v1184_v45 = vld [vmem:[%s1382_s3 + $0x10] sm:$0xff] }
  0x36   :  { %536 = vmatpush.bf16.msrb.mxu1 %v1162_v46  ;;  %v578_v46 = vperm.slane %v1344_v12, 1 }
  0x37   :  { %709 = vmatpush.bf16.msra.mxu2 %v1180_v15 }
  0x38   :  { %629 = vmatpush.bf16.msrb.mxu3 %v1171_v1 }
  0x39   :  { %524 = vmatpush.bf16.msrb.mxu0 %v1153_v47 }
  0x3a   :  { %537 = vmatpush.bf16.msrb.mxu1 %v1161_v48 }
  0x3b   :  { %710 = vmatpush.bf16.msra.mxu2 %v1179_v17 }
  0x3c   :  { %630 = vmatpush.bf16.msrb.mxu3 %v1170_v2 }
  0x3d   :  { %525 = vmatpush.bf16.msrb.mxu0 %v1152_v49 }
  0x3e   :  { %538 = vmatpush.bf16.msrb.mxu1 %v1160_v50  ;;  %1020 = vmatmul.msk.bf16.vlgmr.msrb.gmra.mxu2 %vm465_vm0, %v70_v54  ;;  %v659_v54 = vperm.slane %v1344_v12, 2 }
  0x3f   :  { %711 = vmatpush.bf16.msra.mxu2 %v1178_v21 }
  0x40   :  { %631 = vmatpush.bf16.msrb.mxu3 %v1169_v3 }
  0x41   :  { %526 = vmatpush.bf16.msrb.mxu0 %v1151_v52  ;;  %v1183_v52 = vld [vmem:[%s1382_s3 + $0x8] sm:$0xff] }
  0x42   :  { %539 = vmatpush.bf16.msrb.mxu1 %v1159_v53  ;;  %v1182_v53 = vld [vmem:[%s1382_s3] sm:$0xff] }
  0x43   :  { %712 = vmatpush.bf16.msra.mxu2 %v1177_v23 }
  0x44   :  { %632 = vmatpush.bf16.msrb.mxu3 %v1168_v4 }
  0x45   :  { %527 = vmatpush.bf16.msrb.mxu0 %v1150_v55 }
  0x46   :  { %540 = vmatpush.bf16.msrb.mxu1 %v1158_v56 }
  0x47   :  { %713 = vmatpush.bf16.msra.mxu2 %v1176_v26 }
  0x48   :  { %633 = vmatpush.bf16.msrb.mxu3 %v1167_v5 }
  0x49   :  { %528 = vmatpush.bf16.msrb.mxu0 %v1149_v57 }
  0x4a   :  { %541 = vmatpush.bf16.msrb.mxu1 %v1157_v58 }
  0x4b   :  { %714 = vmatpush.bf16.msra.mxu2 %v1175_v38 }
  0x4c   :  { %529 = vmatmul.bf16.vlgmr.msrb.gmra.mxu0 %v68_v61  ;;  %634 = vmatpush.bf16.msrb.mxu3 %v1166_v8 }
  0x4d   :  { %542 = vmatmul.bf16.vlgmr.msrb.gmra.mxu1 %v69_v62  ;;  %791 = vmatpush.bf16.msra.mxu0 %v1189_v40 }
  0x4f   :  { %715 = vmatpush.bf16.msra.mxu2 %v1174_v39 }
  0x51   :  { %792 = vmatpush.bf16.msra.mxu0 %v1188_v41 }
  0x55   :  { %793 = vmatpush.bf16.msra.mxu0 %v1187_v42 }
  0x59   :  { %794 = vmatpush.bf16.msra.mxu0 %v1186_v43 }
  0x5d   :  { %795 = vmatpush.bf16.msra.mxu0 %v1185_v44 }
  0x61   :  { %796 = vmatpush.bf16.msra.mxu0 %v1184_v45 }
  0x65   :  { %797 = vmatpush.bf16.msra.mxu0 %v1183_v52 }
  0x69   :  { %798 = vmatpush.bf16.msra.mxu0 %v1182_v53 }
  0xa9   :  { %v478_v6 = vpop.f32.mrf.mxu0 }
  0xaa   :  { %v491_v7 = vpop.f32.mrf.mxu1  ;;  %v479_v18 = vadd.f32 %v478_v6, %v170_v16 }
  0xac   :  { %v492_v22 = vadd.f32 %v491_v7, %v479_v18 }
  0xb1   :  { %v480_v9 = vpop.f32.mrf.mxu0  ;;  %v504_v13 = vpop.f32.mrf.mxu2 }
  0xb2   :  { %v493_v10 = vpop.f32.mrf.mxu1  ;;  %v517_v14 = vpop.f32.mrf.mxu3  ;;  %v505_v24 = vadd.f32 %v504_v13, %v492_v22 }
  0xb4   :  { %v518_v27 = vadd.f32 %v517_v14, %v505_v24 }
  0xb9   :  { %v506_v19 = vpop.f32.mrf.mxu2 }
  0xba   :  { %v519_v20 = vpop.f32.mrf.mxu3 }
  0xc1   :  { %v556_v25 = vpop.f32.mrf.mxu2 }
  0xc9   :  { %v530_v28 = vpop.f32.mrf.mxu0  ;;  %v558_v32 = vpop.f32.mrf.mxu2 }
  0xca   :  { %v543_v29 = vpop.f32.mrf.mxu1  ;;  %v531_v30 = vadd.f32 %v530_v28, %v518_v27 }
  0xcc   :  { %v544_v31 = vadd.f32 %v543_v29, %v531_v30 }
  0xce   :  { %v557_v33 = vadd.f32 %v556_v25, %v544_v31 }
  0xd0   :  { %v560_v34 = vmax.f32 %v557_v33, 0.0 }
  0xd1   :  { %v532_v35 = vpop.f32.mrf.mxu0 }
  0xd2   :  { %v545_v36 = vpop.f32.mrf.mxu1  ;;  %v561_v37 = vpack.c.bf16 %v560_v34, %v560_v34 }
  0xd4   :  { %635 = vmatmul.bf16.vlgmr.msrb.gmra.mxu3 %v561_v37 }
 0x157   :  { %v636_v47 = vpop.f32.mrf.mxu3 }
 0x158   :  { %v637_v48 = vadd.f32 %v636_v47, %v578_v46 }
 0x15a   :  { %v640_v49 = vmax.f32 %v637_v48, 0.0 }
 0x15c   :  { %v641_v50 = vpack.c.bf16 %v640_v49, %v640_v49 }
 0x15e   :  { %716 = vmatmul.bf16.vlgmr.msra.gmra.mxu2 %v641_v50 }
 0x15f   :  { %v638_v51 = vpop.f32.mrf.mxu3 }
 0x1e1   :  { %v717_v55 = vpop.f32.mrf.mxu2 }
 0x1e2   :  { %v718_v56 = vadd.f32 %v717_v55, %v659_v54 }
 0x1e4   :  { %v721_v57 = vmax.f32 %v718_v56, 0.0 }
 0x1e6   :  { %v722_v58 = vpack.c.bf16 %v721_v57, %v721_v57 }
 0x1e8   :  { %799 = vmatmul.bf16.vlgmr.msra.gmra.mxu0 %v722_v58 }
 0x1e9   :  { %v719_v59 = vpop.f32.mrf.mxu2 }
 0x265   :  { %v800_v61 = vpop.f32.mrf.mxu0 }
 0x266   :  { %v801_v62 = vadd.f32 %v1195_v60, %v800_v61 }
 0x268   :  { %805 = vst.msk [vmem:[#allocation7] sm:$0xff] %vm804_vm1, %v801_v62 }
 0x269   :  { %816 = dma.vmem_to_hbm [thread:$0]  %s812_s14, 128, %s814_s17, [#allocation4]  }
 0x26d   :  { %v802_v63 = vpop.f32.mrf.mxu0 }
 0x26e   :  { %1272 = dma.done.wait [#allocation4], 128  }
 0x26f   :  { %1273 = vsyncadd [#allocation4], 4294967168 }
 0x270   :  { %821 = vsyncpa [#allocation3], 1 }
 0x271   :  { %822 = vsyncpa [#allocation6], 1 }
 0x272   :  { %823 = vsyncpa [#allocation4], 1 }

</bundles_post_ra>
